<compile_context>
chip_gen: v6e
topology: v6e:2x2x1
jax: 0.10.0
libtpu: 0.0.40
codegen_flags: <defaults>
</compile_context>

<pallas_src>
import math
import functools

import jax
import jax.numpy as jnp
from jax import lax
from jax.experimental import pallas as pl
from jax.experimental.pallas import tpu as pltpu


def _apply_activation(x, act):
    """Matches Activation_Function_Class semantics (f32 compute)."""
    if act == "relu":
        return jnp.maximum(x, 0.0)
    if act == "tanh":
        return jnp.tanh(x)
    if act == "swish":
        # x * sigmoid(x); jax.nn.sigmoid lowers to EUP-friendly logistic.
        return x * jax.nn.sigmoid(x)
    if act == "gelu":
        # gelu_new (tanh approximation), as in the reference module.
        c = math.sqrt(2.0 / math.pi)
        return 0.5 * x * (1.0 + jnp.tanh(c * (x + 0.044715 * x * x * x)))
    if act == "leakyrelu":
        # PyTorch default negative_slope = 0.01
        return jnp.where(x >= 0.0, x, 0.01 * x)
    raise ValueError(f"unsupported activation: {act}")


def _adapter_bert_output_kernel(
    x_ref, res_ref,            # (TM, I), (TM, H)
    wd_ref, bd_ref,            # dense:        (I, H), (1, H)
    g_ref, b_ref,              # layer norm:   (1, H), (1, H)
    wdn_ref, bdn_ref,          # adapter down: (H, D), (1, D)
    wup_ref, bup_ref,          # adapter up:   (D, H), (1, H)
    o_ref,                     # (TM, H)
    *, eps, act,
):
    x = x_ref[...].astype(jnp.float32)

    # Dense output projection: intermediate -> hidden.
    h = jnp.dot(x, wd_ref[...].astype(jnp.float32),
                preferred_element_type=jnp.float32)
    h = h + bd_ref[...].astype(jnp.float32)

    # TODO(synk): training-mode dropout is omitted (eval forward = identity).

    # LayerNorm over the hidden dimension (matches F.layer_norm: biased var).
    mean = jnp.mean(h, axis=-1, keepdims=True)
    centered = h - mean
    var = jnp.mean(centered * centered, axis=-1, keepdims=True)
    hn = centered * lax.rsqrt(var + eps)
    hn = hn * g_ref[...].astype(jnp.float32) + b_ref[...].astype(jnp.float32)

    # Adapter down-projection with the activation fused into its epilogue.
    d = jnp.dot(hn, wdn_ref[...].astype(jnp.float32),
                preferred_element_type=jnp.float32)
    d = _apply_activation(d + bdn_ref[...].astype(jnp.float32), act)

    # Adapter up-projection.
    u = jnp.dot(d, wup_ref[...].astype(jnp.float32),
                preferred_element_type=jnp.float32)
    u = u + bup_ref[...].astype(jnp.float32)

    # Residual add with the block's original input_tensor.
    o_ref[...] = (u + res_ref[...].astype(jnp.float32)).astype(o_ref.dtype)


def meta_adapter_bert_output(
    hidden_states, input_tensor,
    w_dense, b_dense,          # torch layout: (H, I), (H,)
    ln_weight, ln_bias,        # (H,), (H,)
    w_down, b_down,            # torch layout: (D, H), (D,)
    w_up, b_up,                # torch layout: (H, D), (H,)
    *, eps=1e-12, hidden_act="relu", block_rows=256,
):
    """Pallas equivalent of MetaAdapterBertOutput.forward (eval mode)."""
    act = hidden_act.lower()
    orig_shape = input_tensor.shape
    I = hidden_states.shape[-1]
    H = input_tensor.shape[-1]
    D = w_down.shape[0]

    x2d = hidden_states.reshape(-1, I)
    r2d = input_tensor.reshape(-1, H)
    rows = x2d.shape[0]

    # Row tile: multiple of 8 (sublane), capped so per-buffer bytes stay modest
    # (re-derive block_rows smaller for v7x's 64 MiB VMEM if I is very large).
    tm = min(block_rows, ((rows + 7) // 8) * 8)
    rows_pad = pl.cdiv(rows, tm) * tm
    if rows_pad != rows:
        x2d = jnp.pad(x2d, ((0, rows_pad - rows), (0, 0)))
        r2d = jnp.pad(r2d, ((0, rows_pad - rows), (0, 0)))

    # torch Linear stores weights as (out, in); transpose once so the kernel
    # computes plain x @ W on the MXU. Biases as (1, N) 2-D slabs.
    wd_t = w_dense.T                     # (I, H)
    wdn_t = w_down.T                     # (H, D)
    wup_t = w_up.T                       # (D, H)
    bd = b_dense.reshape(1, H)
    bdn = b_down.reshape(1, D)
    bup = b_up.reshape(1, H)
    g = ln_weight.reshape(1, H)
    b = ln_bias.reshape(1, H)

    grid = (rows_pad // tm,)
    kernel = functools.partial(_adapter_bert_output_kernel, eps=eps, act=act)

    def full_spec(shape):
        # Full-extent block, same index every grid step -> stays resident.
        return pl.BlockSpec(shape, lambda i: (0,) * len(shape))

    out2d = pl.pallas_call(
        kernel,
        out_shape=jax.ShapeDtypeStruct((rows_pad, H), input_tensor.dtype),
        grid=grid,
        in_specs=[
            pl.BlockSpec((tm, I), lambda i: (i, 0)),   # hidden_states tile
            pl.BlockSpec((tm, H), lambda i: (i, 0)),   # residual tile
            full_spec(wd_t.shape), full_spec(bd.shape),
            full_spec(g.shape), full_spec(b.shape),
            full_spec(wdn_t.shape), full_spec(bdn.shape),
            full_spec(wup_t.shape), full_spec(bup.shape),
        ],
        out_specs=pl.BlockSpec((tm, H), lambda i: (i, 0)),
        compiler_params=pltpu.CompilerParams(
            dimension_semantics=("parallel",),
            vmem_limit_bytes=32 * 1024 * 1024,
        ),
    )(x2d, r2d, wd_t, bd, g, b, wdn_t, bdn, wup_t, bup)

    return out2d[:rows].reshape(orig_shape)


if __name__ == "__main__":
    key = jax.random.PRNGKey(0)
    # BERT-adapter style small shapes: batch=2, seq=8, hidden=32,
    # intermediate=64, adapter down_sample=16.
    B, S, H, I, D = 2, 8, 32, 64, 16
    ks = jax.random.split(key, 8)

    hidden_states = jax.random.normal(ks[0], (B, S, I), dtype=jnp.float32)
    input_tensor = jax.random.normal(ks[1], (B, S, H), dtype=jnp.float32)

    def xavier(k, shape):
        fan_out, fan_in = shape
        lim = math.sqrt(6.0 / (fan_in + fan_out))
        return jax.random.uniform(k, shape, jnp.float32, -lim, lim)

    # torch-layout (out_features, in_features) weights.
    w_dense = xavier(ks[2], (H, I))
    b_dense = 0.1 * jax.random.normal(ks[3], (H,), dtype=jnp.float32)
    w_down = xavier(ks[4], (D, H))
    b_down = 0.1 * jax.random.normal(ks[5], (D,), dtype=jnp.float32)
    w_up = xavier(ks[6], (H, D))
    b_up = 0.1 * jax.random.normal(ks[7], (H,), dtype=jnp.float32)
    ln_weight = jnp.ones((H,), jnp.float32)
    ln_bias = jnp.zeros((H,), jnp.float32)
    eps = 1e-12

    def ref_forward(act):
        h = hidden_states @ w_dense.T + b_dense
        mean = h.mean(-1, keepdims=True)
        var = ((h - mean) ** 2).mean(-1, keepdims=True)
        hn = (h - mean) / jnp.sqrt(var + eps) * ln_weight + ln_bias
        d = _apply_activation(hn @ w_down.T + b_down, act)
        u = d @ w_up.T + b_up
        return u + input_tensor

    ok = True
    for act in ["relu", "swish", "gelu"]:
        y = jax.block_until_ready(
            meta_adapter_bert_output(
                hidden_states, input_tensor,
                w_dense, b_dense, ln_weight, ln_bias,
                w_down, b_down, w_up, b_up,
                eps=eps, hidden_act=act,
            )
        )
        r = ref_forward(act)
        if not jnp.allclose(y, r, atol=1e-4, rtol=1e-4):
            ok = False
            print(f"MISMATCH for {act}: max err {jnp.max(jnp.abs(y - r))}")

    if ok:
        print("KERNEL_OK")
</pallas_src>

<mosaic_0001>
module attributes {stable_mosaic.version = 11 : i64} {
  func.func @_adapter_bert_output_kernel(%arg0: i32, %arg1: memref<16x64xf32, #tpu.memory_space<vmem>>, %arg2: memref<16x32xf32, #tpu.memory_space<vmem>>, %arg3: memref<64x32xf32, #tpu.memory_space<vmem>>, %arg4: memref<1x32xf32, #tpu.memory_space<vmem>>, %arg5: memref<1x32xf32, #tpu.memory_space<vmem>>, %arg6: memref<1x32xf32, #tpu.memory_space<vmem>>, %arg7: memref<32x16xf32, #tpu.memory_space<vmem>>, %arg8: memref<1x16xf32, #tpu.memory_space<vmem>>, %arg9: memref<16x32xf32, #tpu.memory_space<vmem>>, %arg10: memref<1x32xf32, #tpu.memory_space<vmem>>, %arg11: memref<16x32xf32, #tpu.memory_space<vmem>>) attributes {dimension_semantics = [#tpu.dimension_semantics<parallel>], iteration_bounds = array<i64: 1>, scalar_prefetch = 0 : i64, scratch_operands = 0 : i64, tpu.core_type = #tpu.core_type<tc>, window_params = [{transform_indices = @transform_0, window_bounds = array<i64: 16, 64>}, {transform_indices = @transform_1, window_bounds = array<i64: 16, 32>}, {pipeline_mode = #tpu.pipeline_mode<synchronous>, transform_indices = @transform_2, window_bounds = array<i64: 64, 32>}, {pipeline_mode = #tpu.pipeline_mode<synchronous>, transform_indices = @transform_3, window_bounds = array<i64: 1, 32>}, {pipeline_mode = #tpu.pipeline_mode<synchronous>, transform_indices = @transform_4, window_bounds = array<i64: 1, 32>}, {pipeline_mode = #tpu.pipeline_mode<synchronous>, transform_indices = @transform_5, window_bounds = array<i64: 1, 32>}, {pipeline_mode = #tpu.pipeline_mode<synchronous>, transform_indices = @transform_6, window_bounds = array<i64: 32, 16>}, {pipeline_mode = #tpu.pipeline_mode<synchronous>, transform_indices = @transform_7, window_bounds = array<i64: 1, 16>}, {pipeline_mode = #tpu.pipeline_mode<synchronous>, transform_indices = @transform_8, window_bounds = array<i64: 16, 32>}, {pipeline_mode = #tpu.pipeline_mode<synchronous>, transform_indices = @transform_9, window_bounds = array<i64: 1, 32>}, {transform_indices = @transform_10, window_bounds = array<i64: 16, 32>}]} {
    %c0 = arith.constant 0 : index
    %c0_0 = arith.constant 0 : index
    %0 = vector.load %arg1[%c0, %c0_0] : memref<16x64xf32, #tpu.memory_space<vmem>>, vector<16x64xf32>
    %c0_1 = arith.constant 0 : index
    %c0_2 = arith.constant 0 : index
    %1 = vector.load %arg3[%c0_1, %c0_2] : memref<64x32xf32, #tpu.memory_space<vmem>>, vector<64x32xf32>
    %cst = arith.constant dense<0.000000e+00> : vector<16x32xf32>
    %2 = tpu.matmul %0, %1, %cst {dimension_numbers = #tpu.dot_dimension_numbers<[1], [0], [0], [1], [0, 0, 1, 1], [], []>} : vector<16x64xf32>, vector<64x32xf32>, vector<16x32xf32> -> vector<16x32xf32>
    %c0_3 = arith.constant 0 : index
    %c0_4 = arith.constant 0 : index
    %3 = vector.load %arg4[%c0_3, %c0_4] : memref<1x32xf32, #tpu.memory_space<vmem>>, vector<1x32xf32>
    %4 = vector.broadcast %3 : vector<1x32xf32> to vector<16x32xf32>
    %5 = arith.addf %2, %4 : vector<16x32xf32>
    %cst_5 = arith.constant dense<0.000000e+00> : vector<16xf32>
    %6 = vector.multi_reduction <add>, %5, %cst_5 [1] : vector<16x32xf32> to vector<16xf32>
    %7 = vector.shape_cast %6 : vector<16xf32> to vector<16x1xf32>
    %cst_6 = arith.constant 3.200000e+01 : f32
    %8 = vector.broadcast %cst_6 : f32 to vector<16x1xf32>
    %9 = arith.divf %7, %8 : vector<16x1xf32>
    %10 = vector.broadcast %9 : vector<16x1xf32> to vector<16x32xf32>
    %11 = arith.subf %5, %10 : vector<16x32xf32>
    %12 = arith.mulf %11, %11 : vector<16x32xf32>
    %cst_7 = arith.constant dense<0.000000e+00> : vector<16xf32>
    %13 = vector.multi_reduction <add>, %12, %cst_7 [1] : vector<16x32xf32> to vector<16xf32>
    %14 = vector.shape_cast %13 : vector<16xf32> to vector<16x1xf32>
    %cst_8 = arith.constant 3.200000e+01 : f32
    %15 = vector.broadcast %cst_8 : f32 to vector<16x1xf32>
    %16 = arith.divf %14, %15 : vector<16x1xf32>
    %cst_9 = arith.constant 9.99999996E-13 : f32
    %17 = vector.broadcast %cst_9 : f32 to vector<16x1xf32>
    %18 = arith.addf %16, %17 : vector<16x1xf32>
    %19 = math.rsqrt %18 : vector<16x1xf32>
    %20 = vector.broadcast %19 : vector<16x1xf32> to vector<16x32xf32>
    %21 = arith.mulf %11, %20 : vector<16x32xf32>
    %c0_10 = arith.constant 0 : index
    %c0_11 = arith.constant 0 : index
    %22 = vector.load %arg5[%c0_10, %c0_11] : memref<1x32xf32, #tpu.memory_space<vmem>>, vector<1x32xf32>
    %23 = vector.broadcast %22 : vector<1x32xf32> to vector<16x32xf32>
    %24 = arith.mulf %21, %23 : vector<16x32xf32>
    %c0_12 = arith.constant 0 : index
    %c0_13 = arith.constant 0 : index
    %25 = vector.load %arg6[%c0_12, %c0_13] : memref<1x32xf32, #tpu.memory_space<vmem>>, vector<1x32xf32>
    %26 = vector.broadcast %25 : vector<1x32xf32> to vector<16x32xf32>
    %27 = arith.addf %24, %26 : vector<16x32xf32>
    %c0_14 = arith.constant 0 : index
    %c0_15 = arith.constant 0 : index
    %28 = vector.load %arg7[%c0_14, %c0_15] : memref<32x16xf32, #tpu.memory_space<vmem>>, vector<32x16xf32>
    %cst_16 = arith.constant dense<0.000000e+00> : vector<16x16xf32>
    %29 = tpu.matmul %27, %28, %cst_16 {dimension_numbers = #tpu.dot_dimension_numbers<[1], [0], [0], [1], [0, 0, 1, 1], [], []>} : vector<16x32xf32>, vector<32x16xf32>, vector<16x16xf32> -> vector<16x16xf32>
    %c0_17 = arith.constant 0 : index
    %c0_18 = arith.constant 0 : index
    %30 = vector.load %arg8[%c0_17, %c0_18] : memref<1x16xf32, #tpu.memory_space<vmem>>, vector<1x16xf32>
    %31 = vector.broadcast %30 : vector<1x16xf32> to vector<16x16xf32>
    %32 = arith.addf %29, %31 : vector<16x16xf32>
    %cst_19 = arith.constant 0.000000e+00 : f32
    %33 = vector.broadcast %cst_19 : f32 to vector<16x16xf32>
    %34 = arith.maximumf %32, %33 : vector<16x16xf32>
    %c0_20 = arith.constant 0 : index
    %c0_21 = arith.constant 0 : index
    %35 = vector.load %arg9[%c0_20, %c0_21] : memref<16x32xf32, #tpu.memory_space<vmem>>, vector<16x32xf32>
    %cst_22 = arith.constant dense<0.000000e+00> : vector<16x32xf32>
    %36 = tpu.matmul %34, %35, %cst_22 {dimension_numbers = #tpu.dot_dimension_numbers<[1], [0], [0], [1], [0, 0, 1, 1], [], []>} : vector<16x16xf32>, vector<16x32xf32>, vector<16x32xf32> -> vector<16x32xf32>
    %c0_23 = arith.constant 0 : index
    %c0_24 = arith.constant 0 : index
    %37 = vector.load %arg10[%c0_23, %c0_24] : memref<1x32xf32, #tpu.memory_space<vmem>>, vector<1x32xf32>
    %38 = vector.broadcast %37 : vector<1x32xf32> to vector<16x32xf32>
    %39 = arith.addf %36, %38 : vector<16x32xf32>
    %c0_25 = arith.constant 0 : index
    %c0_26 = arith.constant 0 : index
    %40 = vector.load %arg2[%c0_25, %c0_26] : memref<16x32xf32, #tpu.memory_space<vmem>>, vector<16x32xf32>
    %41 = arith.addf %39, %40 : vector<16x32xf32>
    %c0_27 = arith.constant 0 : index
    %c0_28 = arith.constant 0 : index
    %42 = vector.load %arg11[%c0_27, %c0_28] : memref<16x32xf32, #tpu.memory_space<vmem>>, vector<16x32xf32>
    tpu.vector_store %arg11[%c0_27, %c0_28], %41 {strides = array<i32>} : memref<16x32xf32, #tpu.memory_space<vmem>>, vector<16x32xf32>,
    return
  }
  func.func @transform_0(%arg0: i32) -> (i32, i32) {
    %c0_i32 = arith.constant 0 : i32
    %c0_i32_0 = arith.constant 0 : i32
    return %arg0, %c0_i32 : i32, i32
  }
  func.func @transform_1(%arg0: i32) -> (i32, i32) {
    %c0_i32 = arith.constant 0 : i32
    %c0_i32_0 = arith.constant 0 : i32
    return %arg0, %c0_i32 : i32, i32
  }
  func.func @transform_2(%arg0: i32) -> (i32, i32) {
    %c0_i32 = arith.constant 0 : i32
    %c0_i32_0 = arith.constant 0 : i32
    %c0_i32_1 = arith.constant 0 : i32
    return %c0_i32, %c0_i32_0 : i32, i32
  }
  func.func @transform_3(%arg0: i32) -> (i32, i32) {
    %c0_i32 = arith.constant 0 : i32
    %c0_i32_0 = arith.constant 0 : i32
    %c0_i32_1 = arith.constant 0 : i32
    return %c0_i32, %c0_i32_0 : i32, i32
  }
  func.func @transform_4(%arg0: i32) -> (i32, i32) {
    %c0_i32 = arith.constant 0 : i32
    %c0_i32_0 = arith.constant 0 : i32
    %c0_i32_1 = arith.constant 0 : i32
    return %c0_i32, %c0_i32_0 : i32, i32
  }
  func.func @transform_5(%arg0: i32) -> (i32, i32) {
    %c0_i32 = arith.constant 0 : i32
    %c0_i32_0 = arith.constant 0 : i32
    %c0_i32_1 = arith.constant 0 : i32
    return %c0_i32, %c0_i32_0 : i32, i32
  }
  func.func @transform_6(%arg0: i32) -> (i32, i32) {
    %c0_i32 = arith.constant 0 : i32
    %c0_i32_0 = arith.constant 0 : i32
    %c0_i32_1 = arith.constant 0 : i32
    return %c0_i32, %c0_i32_0 : i32, i32
  }
  func.func @transform_7(%arg0: i32) -> (i32, i32) {
    %c0_i32 = arith.constant 0 : i32
    %c0_i32_0 = arith.constant 0 : i32
    %c0_i32_1 = arith.constant 0 : i32
    return %c0_i32, %c0_i32_0 : i32, i32
  }
  func.func @transform_8(%arg0: i32) -> (i32, i32) {
    %c0_i32 = arith.constant 0 : i32
    %c0_i32_0 = arith.constant 0 : i32
    %c0_i32_1 = arith.constant 0 : i32
    return %c0_i32, %c0_i32_0 : i32, i32
  }
  func.func @transform_9(%arg0: i32) -> (i32, i32) {
    %c0_i32 = arith.constant 0 : i32
    %c0_i32_0 = arith.constant 0 : i32
    %c0_i32_1 = arith.constant 0 : i32
    return %c0_i32, %c0_i32_0 : i32, i32
  }
  func.func @transform_10(%arg0: i32) -> (i32, i32) {
    %c0_i32 = arith.constant 0 : i32
    %c0_i32_0 = arith.constant 0 : i32
    return %arg0, %c0_i32 : i32, i32
  }
}

</mosaic_0001>

<bundles_post_ra>
// kernel: tpu_custom_call.1
= control target key start
LH: loop header
LB: loop body
LE: loop exit
PB: predicated region body
PF: predicated region fallthrough
CT: control target
= control target key end

     0   :  { %vm53_vm0 = vcmask 523264   ;;  %s625_s0 = inlined_call_operand.vmem [shape: f32[16,64], index: 0, kind: input, shape index: {}]   ;;  %s626_s1 = inlined_call_operand.vmem [shape: f32[16,32], index: 1, kind: input, shape index: {}]   ;;  %s627_s2 = inlined_call_operand.vmem [shape: f32[64,32], index: 2, kind: input, shape index: {}]   ;;  %s628_s3 = inlined_call_operand.vmem [shape: f32[1,32], index: 3, kind: input, shape index: {}]   ;;  %s629_s4 = inlined_call_operand.vmem [shape: f32[1,32], index: 4, kind: input, shape index: {}]   ;;  %s630_s5 = inlined_call_operand.vmem [shape: f32[1,32], index: 5, kind: input, shape index: {}]   ;;  %s631_s6 = inlined_call_operand.vmem [shape: f32[32,16], index: 6, kind: input, shape index: {}]   ;;  %s632_s7 = inlined_call_operand.vmem [shape: f32[1,16], index: 7, kind: input, shape index: {}]   ;;  %s633_s8 = inlined_call_operand.vmem [shape: f32[16,32], index: 8, kind: input, shape index: {}]   ;;  %s634_s9 = inlined_call_operand.vmem [shape: f32[1,32], index: 9, kind: input, shape index: {}]   ;;  %s635_s10 = inlined_call_operand.hbm [shape: f32[16,32], index: 10, kind: output, shape index: {}]  }
   0x1   :  { %v45_v0 = vld [vmem:[%s627_s2 + $0x38] sm:$0xff]  ;;  %v44_v1 = vld [vmem:[%s627_s2 + $0x30] sm:$0xff]  ;;  %v43_v2 = vld [vmem:[%s627_s2 + $0x28] sm:$0xff] }
   0x2   :  { %419 = vmatprep.subr.mxu0 %v45_v0  ;;  %v36_v3 = vld [vmem:[%s625_s0] sm:$0xff] }
   0x3   :  { %420 = vmatpush3.msra.mxu0 %v45_v0  ;;  %435 = vmatprep.mubr.msk.f32.mxu0 %vm53_vm0, %v36_v3 }
   0x4   :  { %421 = vmatprep.subr.mxu0 %v44_v1 }
   0x5   :  { %15 = vsyncpa [#allocation3], 0  ;;  %422 = vmatpush3.msra.mxu0 %v44_v1  ;;  %v42_v4 = vld [vmem:[%s627_s2 + $0x20] sm:$0xff]  ;;  %v41_v5 = vld [vmem:[%s627_s2 + $0x18] sm:$0xff]  ;;  %vm135_vm1 = vcmask 261120   ;;  %vm284_vm2 = vcmask 130048  }
   0x6   :  { %423 = vmatprep.subr.mxu0 %v43_v2  ;;  %v40_v6 = vld [vmem:[%s627_s2 + $0x10] sm:$0xff]  ;;  %v39_v7 = vld [vmem:[%s627_s2 + $0x8] sm:$0xff]  ;;  %v38_v8 = vld [vmem:[%s627_s2] sm:$0xff] }
   0x7   :  { %424 = vmatpush3.msra.mxu0 %v43_v2  ;;  %v37_v9 = vld [vmem:[%s625_s0 + $0x8] sm:$0xff]  ;;  %v388_v11 = vld [vmem:[%s628_s3] ss:$0 sm:$0xff]  ;;  %v184_v27 = vld [vmem:[%s631_s6 + $0x18] sm:$0xff] }
   0x8   :  { %425 = vmatprep.subr.mxu0 %v42_v4  ;;  %v183_v28 = vld [vmem:[%s631_s6 + $0x10] sm:$0xff]  ;;  %438 = vmatprep.subr.mxu1 %v184_v27  ;;  %v182_v29 = vld [vmem:[%s631_s6 + $0x8] sm:$0xff]  ;;  %v181_v30 = vld [vmem:[%s631_s6] sm:$0xff] }
   0x9   :  { %426 = vmatpush3.msra.mxu0 %v42_v4  ;;  %439 = vmatpush3.msra.mxu1 %v184_v27  ;;  %v391_v38 = vld [vmem:[%s629_s4] ss:$0 sm:$0xff]  ;;  %v276_v47 = vld [vmem:[%s633_s8 + $0x8] sm:$0xff] }
   0xa   :  { %427 = vmatprep.subr.mxu0 %v41_v5  ;;  %440 = vmatprep.subr.mxu1 %v183_v28  ;;  %v392_v40 = vld [vmem:[%s630_s5] ss:$0 sm:$0xff]  ;;  %v367_v58 = vld [vmem:[%s626_s1 + $0x8] sm:$0xff] }
   0xb   :  { %428 = vmatpush3.msra.mxu0 %v41_v5  ;;  %441 = vmatpush3.msra.mxu1 %v183_v28  ;;  %v275_v48 = vld [vmem:[%s633_s8] sm:$0xff] }
   0xc   :  { %429 = vmatprep.subr.mxu0 %v40_v6  ;;  %442 = vmatprep.subr.mxu1 %v182_v29  ;;  %v393_v49 = vld [vmem:[%s632_s7] ss:$0 sm:$0xff]  ;;  %s485_s7 = smov [#allocation2]  }
   0xd   :  { %430 = vmatpush3.msra.mxu0 %v40_v6  ;;  %443 = vmatpush3.msra.mxu1 %v182_v29  ;;  %v396_v56 = vld [vmem:[%s634_s9] ss:$0 sm:$0xff]  ;;  %s377_s30 = sshll.u32 %s485_s7, 4  ;;  %s378_s30 = int_to_ptr.vmem [resolvable:$true] %s377_s30 }
   0xe   :  { %431 = vmatprep.subr.mxu0 %v39_v7  ;;  %444 = vmatprep.subr.mxu1 %v181_v30  ;;  %v366_v61 = vld [vmem:[%s626_s1] sm:$0xff]  ;;  %s463_s9 = scalar_lea.vmem %s378_s30, 256  ;;  %p468_p1 = scmp.lt.s32.totalorder %s378_s30, %s378_s30 }
   0xf   :  { %432 = vmatpush3.msra.mxu0 %v39_v7  ;;  %445 = vmatpush3.msra.mxu1 %v181_v30  ;;  %p464_p0 = scmp.ne.s32.totalorder %s378_s30, %s463_s9  ;;  %p469_p2 = scmp.lt.s32.totalorder %s463_s9, %s463_s9 }
  0x10   :  { %433 = vmatprep.subr.mxu0 %v38_v8  ;;  %449 = vmatprep.subr.mxu1 %v276_v47 }
  0x11   :  { %434 = vmatpush3.msra.mxu0 %v38_v8  ;;  %p470_p3 = por %p469_p2, %p468_p1 }
  0x12   :  { %436 = vmatmul.mubr.msk.f32.vlgmr.msra.gmra.mxu0 %vm53_vm0, %v37_v9 }
  0x13   :  { %p471_p4 = pnand %p470_p3, %p464_p0 }
  0xd2   :  { %v437_v10 = vpop.f32.mrf.mxu0 }
  0xd3   :  { %v132_v14 = vadd.f32 %v437_v10, %v388_v11 }
  0xd4   :  { %v126_v12 = vpop.f32.mrf.mxu0 }
  0xd5   :  { %v127_v13 = vadd.f32 %v388_v11, %v126_v12  ;;  %v139_v16 = vsel %vm135_vm1, %v132_v14, 0.0 }
  0xd7   :  { %v136_v15 = vsel %vm135_vm1, %v127_v13, 0.0 }
  0xd8   :  { %137 = vadd.xlane.f32.xlu0 %v136_v15 }
  0xdc   :  { %140 = vadd.xlane.f32.xlu0 %v139_v16 }
 0x161   :  { %v138_v17 = vpop.xlane.xlu0 %137 }
 0x162   :  { %v143_v18 = vmul.f32 0.03125, %v138_v17 }
 0x164   :  { %v145_v19 = vsub.f32 %v127_v13, %v143_v18 }
 0x165   :  { %v141_v20 = vpop.xlane.xlu0 %140 }
 0x166   :  { %v144_v21 = vmul.f32 0.03125, %v141_v20  ;;  %v147_v22 = vmul.f32 %v145_v19, %v145_v19 }
 0x168   :  { %v146_v23 = vsub.f32 %v132_v14, %v144_v21  ;;  %v149_v24 = vsel %vm135_vm1, %v147_v22, 0.0 }
 0x169   :  { %150 = vadd.xlane.f32.xlu1 %v149_v24 }
 0x16a   :  { %v148_v25 = vmul.f32 %v146_v23, %v146_v23 }
 0x16c   :  { %v152_v26 = vsel %vm135_vm1, %v148_v25, 0.0 }
 0x16d   :  { %153 = vadd.xlane.f32.xlu1 %v152_v26 }
 0x1f2   :  { %v151_v31 = vpop.xlane.xlu1 %150 }
 0x1f3   :  { %v155_v32 = vmul.f32 0.03125, %v151_v31 }
 0x1f5   :  { %v157_v33 = vadd.f32 1e-12, %v155_v32 }
 0x1f6   :  { %v154_v34 = vpop.xlane.xlu1 %153 }
 0x1f7   :  { %459 = vrsqrt.f32 %v157_v33  ;;  %v156_v35 = vmul.f32 0.03125, %v154_v34 }
 0x1f9   :  { %v158_v36 = vadd.f32 1e-12, %v156_v35 }
 0x1fb   :  { %461 = vrsqrt.f32 %v158_v36 }
 0x204   :  { %v460_v37 = vpop.eup %459 }
 0x205   :  { %v161_v39 = vmul.f32 %v460_v37, %v145_v19 }
 0x207   :  { %v170_v41 = vmul.f32 %v391_v38, %v161_v39 }
 0x208   :  { %v462_v42 = vpop.eup %461 }
 0x209   :  { %v162_v43 = vmul.f32 %v462_v42, %v146_v23  ;;  %v179_v44 = vadd.f32 %v392_v40, %v170_v41 }
 0x20b   :  { %v171_v45 = vmul.f32 %v391_v38, %v162_v43  ;;  %446 = vmatprep.mubr.msk.f32.mxu1 %vm135_vm1, %v179_v44 }
 0x20d   :  { %v180_v46 = vadd.f32 %v392_v40, %v171_v45 }
 0x20f   :  { %447 = vmatmul.mubr.msk.f32.vlgmr.msra.gmra.mxu1 %vm135_vm1, %v180_v46 }
 0x210   :  { %450 = vmatpush3.msra.mxu1 %v276_v47 }
 0x211   :  { %451 = vmatprep.subr.mxu1 %v275_v48 }
 0x212   :  { %452 = vmatpush3.msra.mxu1 %v275_v48 }
 0x2cf   :  { %v448_v50 = vpop.f32.mrf.mxu1 }
 0x2d0   :  { %v270_v51 = vadd.f32 %v448_v50, %v393_v49 }
 0x2d1   :  { %v264_v52 = vpop.f32.mrf.mxu1 }
 0x2d2   :  { %v265_v53 = vadd.f32 %v393_v49, %v264_v52  ;;  %v274_v55 = vmax.f32 %v270_v51, 0.0 }
 0x2d4   :  { %v273_v54 = vmax.f32 %v265_v53, 0.0 }
 0x2d6   :  { %453 = vmatprep.mubr.msk.f32.mxu1 %vm284_vm2, %v273_v54 }
 0x2d7   :  { %454 = vmatmul.mubr.msk.f32.vlgmr.msra.gmra.mxu1 %vm284_vm2, %v274_v55 }
 0x397   :  { %v455_v57 = vpop.f32.mrf.mxu1 }
 0x398   :  { %v363_v59 = vadd.f32 %v455_v57, %v396_v56 }
 0x399   :  { %v357_v60 = vpop.f32.mrf.mxu1 }
 0x39a   :  { %v369_v62 = vadd.f32 %v367_v58, %v363_v59  ;;  %v358_v63 = vadd.f32 %v396_v56, %v357_v60 }
 0x39c   :  { %371 = vst.msk [vmem:[#allocation2 + $0x8] sm:$0xff] %vm135_vm1, %v369_v62  ;;  %v368_v0 = vadd.f32 %v366_v61, %v358_v63 }
 0x39e   :  { %370 = vst.msk [vmem:[#allocation2] sm:$0xff] %vm135_vm1, %v368_v0 }
 0x39f   :  { %474 = shalt.err (!%p471_p4)
}
 0x3a0   :  { %s486_s13 = smov 128   ;;  %s487_s14 = smov 8  }
 0x3a1   :  { %383 = dma.vmem_to_hbm [thread:$0]  %s378_s30, 256, %s635_s10, [#allocation3], %s486_s13, %s486_s13, %s487_s14  }
 0x3a2   :  { %483 = dma.done.wait [#allocation3], 256  }
 0x3a3   :  { %484 = vsyncadd [#allocation3], 4294967040 }
 0x3a4   :  { %387 = vsyncpa [#allocation3], 1 }

</bundles_post_ra>
